<compile_context>
chip_gen: v5e
topology: v5e:2x2
jax: 0.10.0
libtpu: 0.0.40
codegen_flags: <defaults>
</compile_context>

<pallas_src>
import jax
import jax.numpy as jnp
from jax.experimental import pallas as pl
from jax.experimental.pallas import tpu as pltpu

EPS = 1e-5
F32 = jnp.float32
BF16 = jnp.bfloat16   # MXU-native on v5e/v6e/v7x; accumulation stays f32.


# ---------------------------------------------------------------------------
# one-time parameter prep (hoisted out of the per-call hot path)
# ---------------------------------------------------------------------------
def _banded_conv_weight(w_oihw, width):
    """torch OIHW 3x3 weight -> (3, W*Cin, W*Cout) banded matmul weights.

    B[kh, (w+kw-1)*Cin + c, w*Cout + o] = w[o, c, kh, kw]  for 0 <= w+kw-1 < W

    With activations stored lane-dense as rows of length W*Cin, a 3x3 conv
    (padding=1, stride=1) becomes three accumulated matmuls, one per kh:
        y[h] += x[h + kh - 1] @ B[kh]       (out-of-range row -> zeros)
    so kw taps and the width zero-padding are absorbed into the band
    structure and the MXU output dim is the full lane-dense W*Cout row.

    TODO(synk): for real ResNet channel counts (C >= 64) switch to a
    Cout-tiled (128/256-wide) contraction formulation instead; the banded
    form trades ~W/3-fold redundant MXU work for full lane fill, which only
    wins when Cout << 128 (as in this demo).
    """
    cout, cin, kh_, kw_ = w_oihw.shape
    assert (kh_, kw_) == (3, 3)
    wt = jnp.transpose(w_oihw, (2, 3, 1, 0)).astype(F32)      # (kh, kw, ci, co)
    kw = jnp.arange(3)[:, None, None]
    wcol = jnp.arange(width)[None, :, None]
    src = jnp.arange(width)[None, None, :]
    band = (src == wcol + kw - 1).astype(F32)                 # (3, W, W)
    b = jnp.einsum("kwp,akco->apcwo", band, wt)               # (3, W, Ci, W, Co)
    return b.reshape(3, width * cin, width * cout)


def prepare_residual_block_params(w1, w2, width):
    """OIHW -> banded bf16 matmul weights; call once at parameter-load time."""
    return (_banded_conv_weight(w1, width).astype(BF16),
            _banded_conv_weight(w2, width).astype(BF16))


# ---------------------------------------------------------------------------
# kernels
# ---------------------------------------------------------------------------
def _conv3x3_rows(act_f32, w_ref):
    """(H, W*Cin) f32 activation x (3, W*Cin, W*Cout) bf16 banded weights."""
    h, wc = act_f32.shape
    zrow = jnp.zeros((1, wc), F32)
    up = jnp.concatenate([zrow, act_f32[:h - 1, :]], axis=0)   # row h -> act[h-1]
    dn = jnp.concatenate([act_f32[1:, :], zrow], axis=0)       # row h -> act[h+1]
    acc = jnp.dot(up.astype(BF16), w_ref[0], preferred_element_type=F32)
    acc = acc + jnp.dot(act_f32.astype(BF16), w_ref[1], preferred_element_type=F32)
    acc = acc + jnp.dot(dn.astype(BF16), w_ref[2], preferred_element_type=F32)
    return acc                                                 # (H, W*Cout) f32


def _stats_rows(acc):
    """Lane-dense per-image (sum, sumsq) partials; W-reduction happens outside."""
    return jnp.concatenate(
        [jnp.sum(acc, axis=0, keepdims=True),
         jnp.sum(acc * acc, axis=0, keepdims=True)], axis=0)   # (2, W*Cout)


def _conv1_kernel(x_ref, w_ref, y_ref, stats_ref):
    # x_ref:(1,H,W*C) f32 | w_ref:(3,W*C,W*Cout) bf16
    # y_ref:(1,H,W*Cout) bf16 raw conv1 output | stats_ref:(1,2,W*Cout) f32
    acc = _conv3x3_rows(x_ref[0], w_ref)
    y_ref[0] = acc.astype(y_ref.dtype)
    stats_ref[0] = _stats_rows(acc)


def _bn_relu_conv2_kernel(y1_ref, scale_ref, shift_ref, w_ref, y2_ref, stats_ref):
    # Fused BN1 scale/shift + ReLU, then conv2.  Single read of y1, no padded
    # scratch buffer and no per-iteration halo zeroing.
    a = jnp.maximum(
        y1_ref[0].astype(F32) * scale_ref[...] + shift_ref[...], 0.0)
    acc = _conv3x3_rows(a, w_ref)
    y2_ref[0] = acc.astype(y2_ref.dtype)
    stats_ref[0] = _stats_rows(acc)


def _bn_add_relu_kernel(y2_ref, x_ref, scale_ref, shift_ref, out_ref):
    # BN2 scale/shift + identity residual + ReLU; full-lane rows in/out.
    out_ref[0] = jnp.maximum(
        y2_ref[0].astype(F32) * scale_ref[...] + shift_ref[...] + x_ref[0], 0.0)


# ---------------------------------------------------------------------------
# BN folding glue (tiny, runs in plain XLA between the pallas_calls)
# ---------------------------------------------------------------------------
def _fold_bn(stats, gamma, beta, pix_per_image):
    """Per-image lane-dense (sum, sumsq) partials -> fused BN scale/shift.

    Per-image moments are combined with Chan's parallel-variance formula
    (instead of a global E[y^2] - E[y]^2) to avoid catastrophic cancellation
    for large N*H*W.  Training-mode (biased) variance, as in nn.BatchNorm2d.
    """
    n = stats.shape[0]
    cout = gamma.shape[0]
    s = stats.reshape(n, 2, -1, cout).sum(axis=2)       # W-reduce -> (N,2,Cout)
    mean_i = s[:, 0, :] / pix_per_image                 # (N, Cout)
    m2_i = s[:, 1, :] - s[:, 0, :] * mean_i             # per-image sum sq. dev.
    mean = jnp.mean(mean_i, axis=0)                     # equal per-image counts
    m2 = jnp.sum(m2_i, axis=0) + pix_per_image * jnp.sum((mean_i - mean) ** 2,
                                                         axis=0)
    var = m2 / (n * pix_per_image)
    scale = gamma * jax.lax.rsqrt(var + EPS)
    shift = beta - mean * scale
    return scale, shift


# ---------------------------------------------------------------------------
# forward
# ---------------------------------------------------------------------------
def residual_block_forward(x_nchw, w1_band, g1, b1, w2_band, g2, b2):
    """x_nchw:(N,C,H,W) f32; w*_band from prepare_residual_block_params;
    g*,b*:(Cout,) BN affine parameters.  Returns (N,C,H,W) f32."""
    n, c, h, w = x_nchw.shape
    cout = g1.shape[0]
    wc, wco = w * c, w * cout
    # downsample=None + identity residual => Cout == Cin and stride == 1.
    assert cout == c
    assert w1_band.shape == (3, wc, wco) and w2_band.shape == (3, wco, wco)

    # NCHW -> lane-dense (N, H, W*C).  TODO(synk): keep activations in this
    # layout end-to-end in the surrounding model and drop both transposes.
    x_dense = jnp.transpose(x_nchw, (0, 2, 3, 1)).reshape(n, h, wc).astype(F32)

    parallel = pltpu.CompilerParams(dimension_semantics=("parallel",))
    act_spec = pl.BlockSpec((1, h, wco), lambda i: (i, 0, 0))
    w_spec = pl.BlockSpec((3, wc, wco), lambda i: (0, 0, 0))
    stat_spec = pl.BlockSpec((1, 2, wco), lambda i: (i, 0, 0))
    row_spec = pl.BlockSpec((1, wco), lambda i: (0, 0))
    pix = float(h * w)

    # TODO(synk): for large H or N smaller than the core count (v7x), add a
    # second grid axis over row strips (halo rows via manual DMA) so each core
    # gets several pipelined steps and per-step tiles stay well under v7x's
    # 64 MiB VMEM.

    # ---- pass A: conv1 (3 banded bf16 MXU matmuls) + bn1 partial stats -----
    y1, st1 = pl.pallas_call(
        _conv1_kernel,
        grid=(n,),
        in_specs=[act_spec, w_spec],
        out_specs=(act_spec, stat_spec),
        out_shape=(jax.ShapeDtypeStruct((n, h, wco), BF16),
                   jax.ShapeDtypeStruct((n, 2, wco), F32)),
        compiler_params=parallel,
    )(x_dense, w1_band)

    scale1, shift1 = _fold_bn(st1, g1, b1, pix)

    # ---- pass B: fused bn1+relu -> conv2 + bn2 partial stats ----------------
    # scale/shift are data-dependent batch statistics, so the tiny (512 B)
    # tile to the lane-dense (W*Cout,) row layout cannot be hoisted.
    y2, st2 = pl.pallas_call(
        _bn_relu_conv2_kernel,
        grid=(n,),
        in_specs=[act_spec, row_spec, row_spec, w_spec],
        out_specs=(act_spec, stat_spec),
        out_shape=(jax.ShapeDtypeStruct((n, h, wco), BF16),
                   jax.ShapeDtypeStruct((n, 2, wco), F32)),
        compiler_params=parallel,
    )(y1, jnp.tile(scale1, w)[None, :], jnp.tile(shift1, w)[None, :], w2_band)

    scale2, shift2 = _fold_bn(st2, g2, b2, pix)

    # ---- pass C: bn2 + identity residual + relu, lane-dense, f32 ------------
    out_dense = pl.pallas_call(
        _bn_add_relu_kernel,
        grid=(n,),
        in_specs=[act_spec, act_spec, row_spec, row_spec],
        out_specs=act_spec,
        out_shape=jax.ShapeDtypeStruct((n, h, wc), F32),
        compiler_params=parallel,
    )(y2, x_dense, jnp.tile(scale2, w)[None, :], jnp.tile(shift2, w)[None, :])

    # TODO(synk): BatchNorm running_mean/running_var momentum updates are not
    # produced (stateful module bookkeeping, not part of the forward output).
    return jnp.transpose(out_dense.reshape(n, h, w, c), (0, 3, 1, 2))


# ---------------------------------------------------------------------------
# pure-JAX reference and demo
# ---------------------------------------------------------------------------
def _reference_forward(x, w1, g1, b1, w2, g2, b2):
    """Pure-JAX f32 NCHW reference mirroring the PyTorch module (train BN)."""
    def conv(v, w):
        return jax.lax.conv_general_dilated(
            v, w, window_strides=(1, 1), padding=((1, 1), (1, 1)),
            dimension_numbers=("NCHW", "OIHW", "NCHW"))

    def bn(y, g, b):
        mean = jnp.mean(y, axis=(0, 2, 3), keepdims=True)
        var = jnp.mean((y - mean) ** 2, axis=(0, 2, 3), keepdims=True)
        return ((y - mean) * jax.lax.rsqrt(var + EPS)
                * g.reshape(1, -1, 1, 1) + b.reshape(1, -1, 1, 1))

    out = jax.nn.relu(bn(conv(x, w1), g1, b1))
    out = bn(conv(out, w2), g2, b2) + x        # downsample=None -> identity
    return jax.nn.relu(out)


if __name__ == "__main__":
    # in_channels == out_channels (identity residual), stride=1; W*C = 128
    # makes every lane-dense activation row exactly one full 128-lane row.
    N, C, H, W = 2, 8, 16, 16

    key = jax.random.PRNGKey(0)
    kx, kw1, kw2, kg1, kb1, kg2, kb2 = jax.random.split(key, 7)

    x = jax.random.normal(kx, (N, C, H, W), jnp.float32)
    w1 = 0.1 * jax.random.normal(kw1, (C, C, 3, 3), jnp.float32)   # conv1 OIHW
    w2 = 0.1 * jax.random.normal(kw2, (C, C, 3, 3), jnp.float32)   # conv2 OIHW
    g1 = 1.0 + 0.1 * jax.random.normal(kg1, (C,), jnp.float32)     # bn1 gamma
    b1 = 0.1 * jax.random.normal(kb1, (C,), jnp.float32)           # bn1 beta
    g2 = 1.0 + 0.1 * jax.random.normal(kg2, (C,), jnp.float32)     # bn2 gamma
    b2 = 0.1 * jax.random.normal(kb2, (C,), jnp.float32)           # bn2 beta

    # one-time weight re-layout, kept out of the per-step hot path
    w1_band, w2_band = prepare_residual_block_params(w1, w2, W)

    fwd = jax.jit(residual_block_forward)
    out = jax.block_until_ready(fwd(x, w1_band, g1, b1, w2_band, g2, b2))
    ref = jax.block_until_ready(_reference_forward(x, w1, g1, b1, w2, g2, b2))

    assert out.shape == (N, C, H, W)
    # bf16 matmul inputs + bf16 inter-pass buffers vs. an all-f32 reference:
    # expect ~1e-2-level elementwise deviations on O(1) activations.
    err = jnp.abs(out - ref)
    max_err = float(jnp.max(err))
    rms_err = float(jnp.sqrt(jnp.mean(err * err)))
    assert max_err < 1e-1 and rms_err < 3e-2, (max_err, rms_err)

    print("KERNEL_OK")
</pallas_src>

<mosaic_0001>
module attributes {stable_mosaic.version = 11 : i64} {
  func.func @_conv1_kernel(%arg0: i32, %arg1: memref<1x16x128xf32, #tpu.memory_space<vmem>>, %arg2: memref<3x128x128xbf16, #tpu.memory_space<vmem>>, %arg3: memref<1x16x128xbf16, #tpu.memory_space<vmem>>, %arg4: memref<1x2x128xf32, #tpu.memory_space<vmem>>) attributes {dimension_semantics = [#tpu.dimension_semantics<parallel>], iteration_bounds = array<i64: 2>, scalar_prefetch = 0 : i64, scratch_operands = 0 : i64, tpu.core_type = #tpu.core_type<tc>, window_params = [{transform_indices = @transform_0, window_bounds = array<i64: 1, 16, 128>}, {pipeline_mode = #tpu.pipeline_mode<synchronous>, transform_indices = @transform_1, window_bounds = array<i64: 3, 128, 128>}, {transform_indices = @transform_2, window_bounds = array<i64: 1, 16, 128>}, {transform_indices = @transform_3, window_bounds = array<i64: 1, 2, 128>}]} {
    %c0 = arith.constant 0 : index
    %c0_0 = arith.constant 0 : index
    %c0_1 = arith.constant 0 : index
    %0 = vector.load %arg1[%c0, %c0_0, %c0_1] : memref<1x16x128xf32, #tpu.memory_space<vmem>>, vector<1x16x128xf32>
    %1 = vector.shape_cast %0 : vector<1x16x128xf32> to vector<16x128xf32>
    %cst = arith.constant 0.000000e+00 : f32
    %2 = vector.broadcast %cst : f32 to vector<1x128xf32>
    %3 = vector.extract_strided_slice %1 {offsets = [0, 0], sizes = [15, 128], strides = [1, 1]} : vector<16x128xf32> to vector<15x128xf32>
    %4 = tpu.concatenate %2, %3 in 0 : vector<1x128xf32>, vector<15x128xf32> -> vector<16x128xf32>
    %5 = vector.extract_strided_slice %1 {offsets = [1, 0], sizes = [15, 128], strides = [1, 1]} : vector<16x128xf32> to vector<15x128xf32>
    %6 = tpu.concatenate %5, %2 in 0 : vector<15x128xf32>, vector<1x128xf32> -> vector<16x128xf32>
    %7 = arith.truncf %4 : vector<16x128xf32> to vector<16x128xbf16>
    %c0_2 = arith.constant 0 : index
    %c0_3 = arith.constant 0 : index
    %c0_4 = arith.constant 0 : index
    %8 = vector.load %arg2[%c0_2, %c0_3, %c0_4] : memref<3x128x128xbf16, #tpu.memory_space<vmem>>, vector<1x128x128xbf16>
    %9 = vector.shape_cast %8 : vector<1x128x128xbf16> to vector<128x128xbf16>
    %cst_5 = arith.constant dense<0.000000e+00> : vector<16x128xf32>
    %10 = tpu.matmul %7, %9, %cst_5 {dimension_numbers = #tpu.dot_dimension_numbers<[1], [0], [0], [1], [0, 0, 1, 1], [], []>} : vector<16x128xbf16>, vector<128x128xbf16>, vector<16x128xf32> -> vector<16x128xf32>
    %11 = arith.truncf %1 : vector<16x128xf32> to vector<16x128xbf16>
    %c1 = arith.constant 1 : index
    %c0_6 = arith.constant 0 : index
    %c0_7 = arith.constant 0 : index
    %12 = vector.load %arg2[%c1, %c0_6, %c0_7] : memref<3x128x128xbf16, #tpu.memory_space<vmem>>, vector<1x128x128xbf16>
    %13 = vector.shape_cast %12 : vector<1x128x128xbf16> to vector<128x128xbf16>
    %cst_8 = arith.constant dense<0.000000e+00> : vector<16x128xf32>
    %14 = tpu.matmul %11, %13, %cst_8 {dimension_numbers = #tpu.dot_dimension_numbers<[1], [0], [0], [1], [0, 0, 1, 1], [], []>} : vector<16x128xbf16>, vector<128x128xbf16>, vector<16x128xf32> -> vector<16x128xf32>
    %15 = arith.addf %10, %14 : vector<16x128xf32>
    %16 = arith.truncf %6 : vector<16x128xf32> to vector<16x128xbf16>
    %c2 = arith.constant 2 : index
    %c0_9 = arith.constant 0 : index
    %c0_10 = arith.constant 0 : index
    %17 = vector.load %arg2[%c2, %c0_9, %c0_10] : memref<3x128x128xbf16, #tpu.memory_space<vmem>>, vector<1x128x128xbf16>
    %18 = vector.shape_cast %17 : vector<1x128x128xbf16> to vector<128x128xbf16>
    %cst_11 = arith.constant dense<0.000000e+00> : vector<16x128xf32>
    %19 = tpu.matmul %16, %18, %cst_11 {dimension_numbers = #tpu.dot_dimension_numbers<[1], [0], [0], [1], [0, 0, 1, 1], [], []>} : vector<16x128xbf16>, vector<128x128xbf16>, vector<16x128xf32> -> vector<16x128xf32>
    %20 = arith.addf %15, %19 : vector<16x128xf32>
    %21 = arith.truncf %20 : vector<16x128xf32> to vector<16x128xbf16>
    %c0_12 = arith.constant 0 : index
    %c0_13 = arith.constant 0 : index
    %c0_14 = arith.constant 0 : index
    %22 = vector.load %arg3[%c0_12, %c0_13, %c0_14] : memref<1x16x128xbf16, #tpu.memory_space<vmem>>, vector<1x16x128xbf16>
    %23 = vector.shape_cast %22 : vector<1x16x128xbf16> to vector<16x128xbf16>
    %24 = vector.shape_cast %21 : vector<16x128xbf16> to vector<1x16x128xbf16>
    tpu.vector_store %arg3[%c0_12, %c0_13, %c0_14], %24 {strides = array<i32>} : memref<1x16x128xbf16, #tpu.memory_space<vmem>>, vector<1x16x128xbf16>,
    %cst_15 = arith.constant dense<0.000000e+00> : vector<128xf32>
    %25 = vector.multi_reduction <add>, %20, %cst_15 [0] : vector<16x128xf32> to vector<128xf32>
    %26 = vector.shape_cast %25 : vector<128xf32> to vector<1x128xf32>
    %27 = arith.mulf %20, %20 : vector<16x128xf32>
    %cst_16 = arith.constant dense<0.000000e+00> : vector<128xf32>
    %28 = vector.multi_reduction <add>, %27, %cst_16 [0] : vector<16x128xf32> to vector<128xf32>
    %29 = vector.shape_cast %28 : vector<128xf32> to vector<1x128xf32>
    %30 = tpu.concatenate %26, %29 in 0 : vector<1x128xf32>, vector<1x128xf32> -> vector<2x128xf32>
    %c0_17 = arith.constant 0 : index
    %c0_18 = arith.constant 0 : index
    %c0_19 = arith.constant 0 : index
    %31 = vector.load %arg4[%c0_17, %c0_18, %c0_19] : memref<1x2x128xf32, #tpu.memory_space<vmem>>, vector<1x2x128xf32>
    %32 = vector.shape_cast %31 : vector<1x2x128xf32> to vector<2x128xf32>
    %33 = vector.shape_cast %30 : vector<2x128xf32> to vector<1x2x128xf32>
    tpu.vector_store %arg4[%c0_17, %c0_18, %c0_19], %33 {strides = array<i32>} : memref<1x2x128xf32, #tpu.memory_space<vmem>>, vector<1x2x128xf32>,
    return
  }
  func.func @transform_0(%arg0: i32) -> (i32, i32, i32) {
    %c0_i32 = arith.constant 0 : i32
    %c0_i32_0 = arith.constant 0 : i32
    %c0_i32_1 = arith.constant 0 : i32
    return %arg0, %c0_i32, %c0_i32_0 : i32, i32, i32
  }
  func.func @transform_1(%arg0: i32) -> (i32, i32, i32) {
    %c0_i32 = arith.constant 0 : i32
    %c0_i32_0 = arith.constant 0 : i32
    %c0_i32_1 = arith.constant 0 : i32
    %c0_i32_2 = arith.constant 0 : i32
    return %c0_i32, %c0_i32_0, %c0_i32_1 : i32, i32, i32
  }
  func.func @transform_2(%arg0: i32) -> (i32, i32, i32) {
    %c0_i32 = arith.constant 0 : i32
    %c0_i32_0 = arith.constant 0 : i32
    %c0_i32_1 = arith.constant 0 : i32
    return %arg0, %c0_i32, %c0_i32_0 : i32, i32, i32
  }
  func.func @transform_3(%arg0: i32) -> (i32, i32, i32) {
    %c0_i32 = arith.constant 0 : i32
    %c0_i32_0 = arith.constant 0 : i32
    %c0_i32_1 = arith.constant 0 : i32
    return %arg0, %c0_i32, %c0_i32_0 : i32, i32, i32
  }
}

module attributes {stable_mosaic.version = 11 : i64} {
  func.func @_bn_relu_conv2_kernel(%arg0: i32, %arg1: memref<1x16x128xbf16, #tpu.memory_space<vmem>>, %arg2: memref<1x128xf32, #tpu.memory_space<vmem>>, %arg3: memref<1x128xf32, #tpu.memory_space<vmem>>, %arg4: memref<3x128x128xbf16, #tpu.memory_space<vmem>>, %arg5: memref<1x16x128xbf16, #tpu.memory_space<vmem>>, %arg6: memref<1x2x128xf32, #tpu.memory_space<vmem>>) attributes {dimension_semantics = [#tpu.dimension_semantics<parallel>], iteration_bounds = array<i64: 2>, scalar_prefetch = 0 : i64, scratch_operands = 0 : i64, tpu.core_type = #tpu.core_type<tc>, window_params = [{transform_indices = @transform_0, window_bounds = array<i64: 1, 16, 128>}, {pipeline_mode = #tpu.pipeline_mode<synchronous>, transform_indices = @transform_1, window_bounds = array<i64: 1, 128>}, {pipeline_mode = #tpu.pipeline_mode<synchronous>, transform_indices = @transform_2, window_bounds = array<i64: 1, 128>}, {pipeline_mode = #tpu.pipeline_mode<synchronous>, transform_indices = @transform_3, window_bounds = array<i64: 3, 128, 128>}, {transform_indices = @transform_4, window_bounds = array<i64: 1, 16, 128>}, {transform_indices = @transform_5, window_bounds = array<i64: 1, 2, 128>}]} {
    %c0 = arith.constant 0 : index
    %c0_0 = arith.constant 0 : index
    %c0_1 = arith.constant 0 : index
    %0 = vector.load %arg1[%c0, %c0_0, %c0_1] : memref<1x16x128xbf16, #tpu.memory_space<vmem>>, vector<1x16x128xbf16>
    %1 = vector.shape_cast %0 : vector<1x16x128xbf16> to vector<16x128xbf16>
    %2 = arith.extf %1 : vector<16x128xbf16> to vector<16x128xf32>
    %c0_2 = arith.constant 0 : index
    %c0_3 = arith.constant 0 : index
    %3 = vector.load %arg2[%c0_2, %c0_3] : memref<1x128xf32, #tpu.memory_space<vmem>>, vector<1x128xf32>
    %4 = vector.broadcast %3 : vector<1x128xf32> to vector<16x128xf32>
    %5 = arith.mulf %2, %4 : vector<16x128xf32>
    %c0_4 = arith.constant 0 : index
    %c0_5 = arith.constant 0 : index
    %6 = vector.load %arg3[%c0_4, %c0_5] : memref<1x128xf32, #tpu.memory_space<vmem>>, vector<1x128xf32>
    %7 = vector.broadcast %6 : vector<1x128xf32> to vector<16x128xf32>
    %8 = arith.addf %5, %7 : vector<16x128xf32>
    %cst = arith.constant 0.000000e+00 : f32
    %9 = vector.broadcast %cst : f32 to vector<16x128xf32>
    %10 = arith.maximumf %8, %9 : vector<16x128xf32>
    %cst_6 = arith.constant 0.000000e+00 : f32
    %11 = vector.broadcast %cst_6 : f32 to vector<1x128xf32>
    %12 = vector.extract_strided_slice %10 {offsets = [0, 0], sizes = [15, 128], strides = [1, 1]} : vector<16x128xf32> to vector<15x128xf32>
    %13 = tpu.concatenate %11, %12 in 0 : vector<1x128xf32>, vector<15x128xf32> -> vector<16x128xf32>
    %14 = vector.extract_strided_slice %10 {offsets = [1, 0], sizes = [15, 128], strides = [1, 1]} : vector<16x128xf32> to vector<15x128xf32>
    %15 = tpu.concatenate %14, %11 in 0 : vector<15x128xf32>, vector<1x128xf32> -> vector<16x128xf32>
    %16 = arith.truncf %13 : vector<16x128xf32> to vector<16x128xbf16>
    %c0_7 = arith.constant 0 : index
    %c0_8 = arith.constant 0 : index
    %c0_9 = arith.constant 0 : index
    %17 = vector.load %arg4[%c0_7, %c0_8, %c0_9] : memref<3x128x128xbf16, #tpu.memory_space<vmem>>, vector<1x128x128xbf16>
    %18 = vector.shape_cast %17 : vector<1x128x128xbf16> to vector<128x128xbf16>
    %cst_10 = arith.constant dense<0.000000e+00> : vector<16x128xf32>
    %19 = tpu.matmul %16, %18, %cst_10 {dimension_numbers = #tpu.dot_dimension_numbers<[1], [0], [0], [1], [0, 0, 1, 1], [], []>} : vector<16x128xbf16>, vector<128x128xbf16>, vector<16x128xf32> -> vector<16x128xf32>
    %20 = arith.truncf %10 : vector<16x128xf32> to vector<16x128xbf16>
    %c1 = arith.constant 1 : index
    %c0_11 = arith.constant 0 : index
    %c0_12 = arith.constant 0 : index
    %21 = vector.load %arg4[%c1, %c0_11, %c0_12] : memref<3x128x128xbf16, #tpu.memory_space<vmem>>, vector<1x128x128xbf16>
    %22 = vector.shape_cast %21 : vector<1x128x128xbf16> to vector<128x128xbf16>
    %cst_13 = arith.constant dense<0.000000e+00> : vector<16x128xf32>
    %23 = tpu.matmul %20, %22, %cst_13 {dimension_numbers = #tpu.dot_dimension_numbers<[1], [0], [0], [1], [0, 0, 1, 1], [], []>} : vector<16x128xbf16>, vector<128x128xbf16>, vector<16x128xf32> -> vector<16x128xf32>
    %24 = arith.addf %19, %23 : vector<16x128xf32>
    %25 = arith.truncf %15 : vector<16x128xf32> to vector<16x128xbf16>
    %c2 = arith.constant 2 : index
    %c0_14 = arith.constant 0 : index
    %c0_15 = arith.constant 0 : index
    %26 = vector.load %arg4[%c2, %c0_14, %c0_15] : memref<3x128x128xbf16, #tpu.memory_space<vmem>>, vector<1x128x128xbf16>
    %27 = vector.shape_cast %26 : vector<1x128x128xbf16> to vector<128x128xbf16>
    %cst_16 = arith.constant dense<0.000000e+00> : vector<16x128xf32>
    %28 = tpu.matmul %25, %27, %cst_16 {dimension_numbers = #tpu.dot_dimension_numbers<[1], [0], [0], [1], [0, 0, 1, 1], [], []>} : vector<16x128xbf16>, vector<128x128xbf16>, vector<16x128xf32> -> vector<16x128xf32>
    %29 = arith.addf %24, %28 : vector<16x128xf32>
    %30 = arith.truncf %29 : vector<16x128xf32> to vector<16x128xbf16>
    %c0_17 = arith.constant 0 : index
    %c0_18 = arith.constant 0 : index
    %c0_19 = arith.constant 0 : index
    %31 = vector.load %arg5[%c0_17, %c0_18, %c0_19] : memref<1x16x128xbf16, #tpu.memory_space<vmem>>, vector<1x16x128xbf16>
    %32 = vector.shape_cast %31 : vector<1x16x128xbf16> to vector<16x128xbf16>
    %33 = vector.shape_cast %30 : vector<16x128xbf16> to vector<1x16x128xbf16>
    tpu.vector_store %arg5[%c0_17, %c0_18, %c0_19], %33 {strides = array<i32>} : memref<1x16x128xbf16, #tpu.memory_space<vmem>>, vector<1x16x128xbf16>,
    %cst_20 = arith.constant dense<0.000000e+00> : vector<128xf32>
    %34 = vector.multi_reduction <add>, %29, %cst_20 [0] : vector<16x128xf32> to vector<128xf32>
    %35 = vector.shape_cast %34 : vector<128xf32> to vector<1x128xf32>
    %36 = arith.mulf %29, %29 : vector<16x128xf32>
    %cst_21 = arith.constant dense<0.000000e+00> : vector<128xf32>
    %37 = vector.multi_reduction <add>, %36, %cst_21 [0] : vector<16x128xf32> to vector<128xf32>
    %38 = vector.shape_cast %37 : vector<128xf32> to vector<1x128xf32>
    %39 = tpu.concatenate %35, %38 in 0 : vector<1x128xf32>, vector<1x128xf32> -> vector<2x128xf32>
    %c0_22 = arith.constant 0 : index
    %c0_23 = arith.constant 0 : index
    %c0_24 = arith.constant 0 : index
    %40 = vector.load %arg6[%c0_22, %c0_23, %c0_24] : memref<1x2x128xf32, #tpu.memory_space<vmem>>, vector<1x2x128xf32>
    %41 = vector.shape_cast %40 : vector<1x2x128xf32> to vector<2x128xf32>
    %42 = vector.shape_cast %39 : vector<2x128xf32> to vector<1x2x128xf32>
    tpu.vector_store %arg6[%c0_22, %c0_23, %c0_24], %42 {strides = array<i32>} : memref<1x2x128xf32, #tpu.memory_space<vmem>>, vector<1x2x128xf32>,
    return
  }
  func.func @transform_0(%arg0: i32) -> (i32, i32, i32) {
    %c0_i32 = arith.constant 0 : i32
    %c0_i32_0 = arith.constant 0 : i32
    %c0_i32_1 = arith.constant 0 : i32
    return %arg0, %c0_i32, %c0_i32_0 : i32, i32, i32
  }
  func.func @transform_1(%arg0: i32) -> (i32, i32) {
    %c0_i32 = arith.constant 0 : i32
    %c0_i32_0 = arith.constant 0 : i32
    %c0_i32_1 = arith.constant 0 : i32
    return %c0_i32, %c0_i32_0 : i32, i32
  }
  func.func @transform_2(%arg0: i32) -> (i32, i32) {
    %c0_i32 = arith.constant 0 : i32
    %c0_i32_0 = arith.constant 0 : i32
    %c0_i32_1 = arith.constant 0 : i32
    return %c0_i32, %c0_i32_0 : i32, i32
  }
  func.func @transform_3(%arg0: i32) -> (i32, i32, i32) {
    %c0_i32 = arith.constant 0 : i32
    %c0_i32_0 = arith.constant 0 : i32
    %c0_i32_1 = arith.constant 0 : i32
    %c0_i32_2 = arith.constant 0 : i32
    return %c0_i32, %c0_i32_0, %c0_i32_1 : i32, i32, i32
  }
  func.func @transform_4(%arg0: i32) -> (i32, i32, i32) {
    %c0_i32 = arith.constant 0 : i32
    %c0_i32_0 = arith.constant 0 : i32
    %c0_i32_1 = arith.constant 0 : i32
    return %arg0, %c0_i32, %c0_i32_0 : i32, i32, i32
  }
  func.func @transform_5(%arg0: i32) -> (i32, i32, i32) {
    %c0_i32 = arith.constant 0 : i32
    %c0_i32_0 = arith.constant 0 : i32
    %c0_i32_1 = arith.constant 0 : i32
    return %arg0, %c0_i32, %c0_i32_0 : i32, i32, i32
  }
}

module attributes {stable_mosaic.version = 11 : i64} {
  func.func @_bn_add_relu_kernel(%arg0: i32, %arg1: memref<1x16x128xbf16, #tpu.memory_space<vmem>>, %arg2: memref<1x16x128xf32, #tpu.memory_space<vmem>>, %arg3: memref<1x128xf32, #tpu.memory_space<vmem>>, %arg4: memref<1x128xf32, #tpu.memory_space<vmem>>, %arg5: memref<1x16x128xf32, #tpu.memory_space<vmem>>) attributes {dimension_semantics = [#tpu.dimension_semantics<parallel>], iteration_bounds = array<i64: 2>, scalar_prefetch = 0 : i64, scratch_operands = 0 : i64, tpu.core_type = #tpu.core_type<tc>, window_params = [{transform_indices = @transform_0, window_bounds = array<i64: 1, 16, 128>}, {transform_indices = @transform_1, window_bounds = array<i64: 1, 16, 128>}, {pipeline_mode = #tpu.pipeline_mode<synchronous>, transform_indices = @transform_2, window_bounds = array<i64: 1, 128>}, {pipeline_mode = #tpu.pipeline_mode<synchronous>, transform_indices = @transform_3, window_bounds = array<i64: 1, 128>}, {transform_indices = @transform_4, window_bounds = array<i64: 1, 16, 128>}]} {
    %c0 = arith.constant 0 : index
    %c0_0 = arith.constant 0 : index
    %c0_1 = arith.constant 0 : index
    %0 = vector.load %arg1[%c0, %c0_0, %c0_1] : memref<1x16x128xbf16, #tpu.memory_space<vmem>>, vector<1x16x128xbf16>
    %1 = vector.shape_cast %0 : vector<1x16x128xbf16> to vector<16x128xbf16>
    %2 = arith.extf %1 : vector<16x128xbf16> to vector<16x128xf32>
    %c0_2 = arith.constant 0 : index
    %c0_3 = arith.constant 0 : index
    %3 = vector.load %arg3[%c0_2, %c0_3] : memref<1x128xf32, #tpu.memory_space<vmem>>, vector<1x128xf32>
    %4 = vector.broadcast %3 : vector<1x128xf32> to vector<16x128xf32>
    %5 = arith.mulf %2, %4 : vector<16x128xf32>
    %c0_4 = arith.constant 0 : index
    %c0_5 = arith.constant 0 : index
    %6 = vector.load %arg4[%c0_4, %c0_5] : memref<1x128xf32, #tpu.memory_space<vmem>>, vector<1x128xf32>
    %7 = vector.broadcast %6 : vector<1x128xf32> to vector<16x128xf32>
    %8 = arith.addf %5, %7 : vector<16x128xf32>
    %c0_6 = arith.constant 0 : index
    %c0_7 = arith.constant 0 : index
    %c0_8 = arith.constant 0 : index
    %9 = vector.load %arg2[%c0_6, %c0_7, %c0_8] : memref<1x16x128xf32, #tpu.memory_space<vmem>>, vector<1x16x128xf32>
    %10 = vector.shape_cast %9 : vector<1x16x128xf32> to vector<16x128xf32>
    %11 = arith.addf %8, %10 : vector<16x128xf32>
    %cst = arith.constant 0.000000e+00 : f32
    %12 = vector.broadcast %cst : f32 to vector<16x128xf32>
    %13 = arith.maximumf %11, %12 : vector<16x128xf32>
    %c0_9 = arith.constant 0 : index
    %c0_10 = arith.constant 0 : index
    %c0_11 = arith.constant 0 : index
    %14 = vector.load %arg5[%c0_9, %c0_10, %c0_11] : memref<1x16x128xf32, #tpu.memory_space<vmem>>, vector<1x16x128xf32>
    %15 = vector.shape_cast %14 : vector<1x16x128xf32> to vector<16x128xf32>
    %16 = vector.shape_cast %13 : vector<16x128xf32> to vector<1x16x128xf32>
    tpu.vector_store %arg5[%c0_9, %c0_10, %c0_11], %16 {strides = array<i32>} : memref<1x16x128xf32, #tpu.memory_space<vmem>>, vector<1x16x128xf32>,
    return
  }
  func.func @transform_0(%arg0: i32) -> (i32, i32, i32) {
    %c0_i32 = arith.constant 0 : i32
    %c0_i32_0 = arith.constant 0 : i32
    %c0_i32_1 = arith.constant 0 : i32
    return %arg0, %c0_i32, %c0_i32_0 : i32, i32, i32
  }
  func.func @transform_1(%arg0: i32) -> (i32, i32, i32) {
    %c0_i32 = arith.constant 0 : i32
    %c0_i32_0 = arith.constant 0 : i32
    %c0_i32_1 = arith.constant 0 : i32
    return %arg0, %c0_i32, %c0_i32_0 : i32, i32, i32
  }
  func.func @transform_2(%arg0: i32) -> (i32, i32) {
    %c0_i32 = arith.constant 0 : i32
    %c0_i32_0 = arith.constant 0 : i32
    %c0_i32_1 = arith.constant 0 : i32
    return %c0_i32, %c0_i32_0 : i32, i32
  }
  func.func @transform_3(%arg0: i32) -> (i32, i32) {
    %c0_i32 = arith.constant 0 : i32
    %c0_i32_0 = arith.constant 0 : i32
    %c0_i32_1 = arith.constant 0 : i32
    return %c0_i32, %c0_i32_0 : i32, i32
  }
  func.func @transform_4(%arg0: i32) -> (i32, i32, i32) {
    %c0_i32 = arith.constant 0 : i32
    %c0_i32_0 = arith.constant 0 : i32
    %c0_i32_1 = arith.constant 0 : i32
    return %arg0, %c0_i32, %c0_i32_0 : i32, i32, i32
  }
}

</mosaic_0001>

<bundles_post_ra>
// kernel: tile.28
= control target key start
LH: loop header
LB: loop body
LE: loop exit
PB: predicated region body
PF: predicated region fallthrough
CT: control target
= control target key end

     0   :  { %s28_s0 = inlined_call_operand.vmem [shape: f32[8], index: 0, kind: input, shape index: {}]   ;;  %s29_s1 = inlined_call_operand.vmem [shape: f32[16,8], index: 1, kind: output, shape index: {}]  }
   0x1   :  { %v4_v0 = vld [vmem:[%s28_s0] ss:$0 sm:$0xff] }
   0x2   :  { %5 = vst [vmem:[%s29_s1] sm:$0xff] %v4_v0 }
   0x3   :  { %8 = vst [vmem:[%s29_s1 + $0x8] sm:$0xff] %v4_v0 }

// kernel: tile.29
= control target key start
LH: loop header
LB: loop body
LE: loop exit
PB: predicated region body
PF: predicated region fallthrough
CT: control target
= control target key end

     0   :  { %s131_s10 = smov 120   ;;  %s132_s11 = smov 104   ;;  %vm3_vm0 = vcmask 64512   ;;  %vm9_vm1 = vcmask 1048512   ;;  %vm15_vm2 = vcmask 982912   ;;  %vm21_vm3 = vcmask 917312   ;;  %s207_s0 = inlined_call_operand.vmem [shape: f32[16,8], index: 0, kind: input, shape index: {}]   ;;  %s208_s1 = inlined_call_operand.vmem [shape: f32[1,128], index: 1, kind: output, shape index: {}]  }
   0x1   :  { %v101_v0 = vld [vmem:[%s207_s0 + $0xf] sm:$0x1]   ;;  %v103_v1 = vld [vmem:[%s207_s0 + $0xd] sm:$0x1]   ;;  %v105_v2 = vld [vmem:[%s207_s0 + $0xb] sm:$0x1]  }
   0x2   :  { %7 = vrot.lane.b32.xlu0 %v101_v0, %s131_s10  ;;  %19 = vrot.lane.b32.xlu1 %v103_v1, %s132_s11  ;;  %s133_s14 = smov 88   ;;  %v102_v3 = vld [vmem:[%s207_s0 + $0xe] sm:$0x1]   ;;  %v104_v4 = vld [vmem:[%s207_s0 + $0xc] sm:$0x1]   ;;  %s134_s19 = smov 112  }
   0x3   :  { %31 = vrot.lane.b32.xlu2 %v105_v2, %s133_s14  ;;  %s135_s20 = smov 96   ;;  %v106_v5 = vld [vmem:[%s207_s0 + $0xa] sm:$0x1]   ;;  %s136_s23 = smov 80   ;;  %v107_v6 = vld [vmem:[%s207_s0 + $0x9] sm:$0x1]  }
   0x4   :  { %v108_v7 = vld [vmem:[%s207_s0 + $0x8] sm:$0x1]   ;;  %s137_s28 = smov 72   ;;  %s138_s29 = smov 64   ;;  %v109_v8 = vld [vmem:[%s207_s0 + $0x7] sm:$0x1]  }
   0x5   :  { %s139_s3 = smov 56   ;;  %v110_v9 = vld [vmem:[%s207_s0 + $0x6] sm:$0x1]   ;;  %v111_v10 = vld [vmem:[%s207_s0 + $0x5] sm:$0x1]   ;;  %s140_s8 = smov 48  }
   0x6   :  { %s141_s9 = smov 40   ;;  %v112_v11 = vld [vmem:[%s207_s0 + $0x4] sm:$0x1]   ;;  %s142_s12 = smov 32   ;;  %v113_v12 = vld [vmem:[%s207_s0 + $0x3] sm:$0x1]  }
   0x7   :  { %v114_v13 = vld [vmem:[%s207_s0 + $0x2] sm:$0x1]   ;;  %s143_s17 = smov 24   ;;  %s144_s18 = smov 16   ;;  %v115_v14 = vld [vmem:[%s207_s0 + $0x1] sm:$0x1]  }
   0x8   :  { %s145_s21 = smov 8   ;;  %v2_v15 = vld [vmem:[%s207_s0] sm:$0x1]   ;;  %vm27_vm4 = vcmask 851712   ;;  %vm33_vm5 = vcmask 786112   ;;  %vm39_vm6 = vcmask 720512  }
   0x9   :  { %4 = vst.msk [vmem:[#allocation0] sm:$0x1] %vm3_vm0, %v2_v15   ;;  %vm45_vm7 = vcmask 654912   ;;  %vm51_vm8 = vcmask 589312   ;;  %vm57_vm9 = vcmask 523712   ;;  %vm63_vm10 = vcmask 458112  }
   0xa   :  { %13 = vrot.lane.b32.xlu0 %v102_v3, %s134_s19  ;;  %25 = vrot.lane.b32.xlu1 %v104_v4, %s135_s20  ;;  %vm69_vm11 = vcmask 392512   ;;  %vm75_vm12 = vcmask 326912   ;;  %vm81_vm13 = vcmask 261312   ;;  %vm87_vm14 = vcmask 195712  }
   0xb   :  { %37 = vrot.lane.b32.xlu2 %v106_v5, %s136_s23  ;;  %vm93_vm15 = vcmask 130112  }
  0x12   :  { %43 = vrot.lane.b32.xlu0 %v107_v6, %s137_s28  ;;  %49 = vrot.lane.b32.xlu1 %v108_v7, %s138_s29 }
  0x13   :  { %55 = vrot.lane.b32.xlu2 %v109_v8, %s139_s3 }
  0x1a   :  { %61 = vrot.lane.b32.xlu0 %v110_v9, %s140_s8  ;;  %67 = vrot.lane.b32.xlu1 %v111_v10, %s141_s9 }
  0x1b   :  { %73 = vrot.lane.b32.xlu2 %v112_v11, %s142_s12 }
  0x22   :  { %79 = vrot.lane.b32.xlu0 %v113_v12, %s143_s17  ;;  %85 = vrot.lane.b32.xlu1 %v114_v13, %s144_s18 }
  0x23   :  { %91 = vrot.lane.b32.xlu2 %v115_v14, %s145_s21 }
  0x5d   :  { %v32_v16 = vpop.permute.xlu2 %31  }
  0x65   :  { %v38_v17 = vpop.permute.xlu2 %37  }
  0x6d   :  { %v56_v18 = vpop.permute.xlu2 %55  }
  0x74   :  { %v8_v19 = vpop.permute.xlu0 %7   ;;  %v20_v20 = vpop.permute.xlu1 %19  }
  0x75   :  { %10 = vst.msk [vmem:[#allocation0] sm:$0x1] %vm9_vm1, %v8_v19   ;;  %v74_v21 = vpop.permute.xlu2 %73  }
  0x7c   :  { %v14_v22 = vpop.permute.xlu0 %13   ;;  %v26_v23 = vpop.permute.xlu1 %25  }
  0x7d   :  { %16 = vst.msk [vmem:[#allocation0] sm:$0x1] %vm15_vm2, %v14_v22   ;;  %v92_v24 = vpop.permute.xlu2 %91  }
  0x7e   :  { %22 = vst.msk [vmem:[#allocation0] sm:$0x1] %vm21_vm3, %v20_v20  }
  0x7f   :  { %28 = vst.msk [vmem:[#allocation0] sm:$0x1] %vm27_vm4, %v26_v23  }
  0x80   :  { %34 = vst.msk [vmem:[#allocation0] sm:$0x1] %vm33_vm5, %v32_v16  }
  0x81   :  { %40 = vst.msk [vmem:[#allocation0] sm:$0x1] %vm39_vm6, %v38_v17  }
  0x84   :  { %v44_v25 = vpop.permute.xlu0 %43   ;;  %v50_v26 = vpop.permute.xlu1 %49  }
  0x85   :  { %46 = vst.msk [vmem:[#allocation0] sm:$0x1] %vm45_vm7, %v44_v25  }
  0x86   :  { %52 = vst.msk [vmem:[#allocation0] sm:$0x1] %vm51_vm8, %v50_v26  }
  0x87   :  { %58 = vst.msk [vmem:[#allocation0] sm:$0x1] %vm57_vm9, %v56_v18  }
  0x8c   :  { %v62_v27 = vpop.permute.xlu0 %61   ;;  %v68_v28 = vpop.permute.xlu1 %67  }
  0x8d   :  { %64 = vst.msk [vmem:[#allocation0] sm:$0x1] %vm63_vm10, %v62_v27  }
  0x8e   :  { %70 = vst.msk [vmem:[#allocation0] sm:$0x1] %vm69_vm11, %v68_v28  }
  0x8f   :  { %76 = vst.msk [vmem:[#allocation0] sm:$0x1] %vm75_vm12, %v74_v21  }
  0x94   :  { %v80_v29 = vpop.permute.xlu0 %79   ;;  %v86_v30 = vpop.permute.xlu1 %85  }
  0x95   :  { %82 = vst.msk [vmem:[#allocation0] sm:$0x1] %vm81_vm13, %v80_v29  }
  0x96   :  { %88 = vst.msk [vmem:[#allocation0] sm:$0x1] %vm87_vm14, %v86_v30  }
  0x97   :  { %94 = vst.msk [vmem:[#allocation0] sm:$0x1] %vm93_vm15, %v92_v24  }
  0x9e   :  { %v97_v31 = vld [vmem:[#allocation0] sm:$0x1] }
  0x9f   :  { %100 = vst [vmem:[%s208_s1] sm:$0x1] %v97_v31 }

// kernel: residual_block_forward.3
= control target key start
LH: loop header
LB: loop body
LE: loop exit
PB: predicated region body
PF: predicated region fallthrough
CT: control target
= control target key end

     0   :  { %s765_s12 = smov 0   ;;  %s867_s0 = inlined_call_operand.vmem [shape: f32[2,16,128], index: 0, kind: input, shape index: {}]   ;;  %s868_s1 = inlined_call_operand.vmem [shape: bf16[3,128,128], index: 1, kind: input, shape index: {}]   ;;  %s869_s2 = inlined_call_operand.vmem [shape: bf16[2,16,128], index: 2, kind: output, shape index: {0}]   ;;  %s870_s3 = inlined_call_operand.vmem [shape: f32[2,2,128], index: 3, kind: output, shape index: {1}]  }
   0x1 LB: > { %s549_s13 = sadd.s32 4294967295, %s742_s12   ;;  %p553_p0 = scmp.ge.s32.totalorder %s742_s12, 1  ;;  %s742_s12 = sphi %s765_s12, %s14_s12  }
   0x2   : > { %p140_p1 = scmp.lt.s32.totalorder %s742_s12, 3 }
   0x4   : > { %p141_p2 = pnand %p553_p0, %p140_p1 }
   0x5   : > { %p168_p3 = scmp.lt.s32.totalorder (!%p141_p2), %s549_s13, 1 }
   0x6   : > { %144 = sbr.rel (%p141_p2) target bundleno = 205 (0xcd), region = 28 }
   0xb   : > { %v713_v0 = vld [vmem:[%s868_s1 + $0x78] sm:$0xff]  ;;  %v712_v3 = vld [vmem:[%s868_s1 + $0x70] sm:$0xff]  ;;  %v711_v6 = vld [vmem:[%s868_s1 + $0x68] sm:$0xff]  ;;  %s872_s13 = smov (!%p168_p3, %s549_s13), 1  ;;  %vm186_vm0 = vcmask 1040384   ;;  %vm193_vm1 = vcmask 1046528  }
   0xc   : > { %v705_v1 = vld [vmem:[%s868_s1 + $0x38] sm:$0xff]  ;;  %283 = vmatpush.bf16.msra.mxu0 %v713_v0  ;;  %v704_v4 = vld [vmem:[%s868_s1 + $0x30] sm:$0xff]  ;;  %v703_v7 = vld [vmem:[%s868_s1 + $0x28] sm:$0xff]  ;;  %s696_s11 = sshll.u32 %s872_s13, 4  ;;  %vm744_vm3 = vmmov 1   ;;  %s697_s16 = sshll.u32 %s872_s13, 3 }
   0xd   : > { %v721_v2 = vld [vmem:[%s868_s1 + $0xb8] sm:$0xff]  ;;  %345 = vmatpush.bf16.msra.mxu1 %v705_v1  ;;  %v720_v5 = vld [vmem:[%s868_s1 + $0xb0] sm:$0xff]  ;;  %v719_v8 = vld [vmem:[%s868_s1 + $0xa8] sm:$0xff]  ;;  %s172_s22 = scalar_lea.vmem %s867_s0, %s696_s11  ;;  %s177_s19 = scalar_lea.vmem %s869_s2, %s697_s16 }
   0xe   : > { %425 = vmatpush.bf16.msra.mxu2 %v721_v2  ;;  %v710_v9 = vld [vmem:[%s868_s1 + $0x60] sm:$0xff]  ;;  %v709_v12 = vld [vmem:[%s868_s1 + $0x58] sm:$0xff]  ;;  %v708_v15 = vld [vmem:[%s868_s1 + $0x50] sm:$0xff]  ;;  %s558_s20 = sshll.u32 %s872_s13, 1 }
   0xf   : > { %v702_v10 = vld [vmem:[%s868_s1 + $0x20] sm:$0xff]  ;;  %v701_v13 = vld [vmem:[%s868_s1 + $0x18] sm:$0xff]  ;;  %v700_v16 = vld [vmem:[%s868_s1 + $0x10] sm:$0xff]  ;;  %s181_s23 = scalar_lea.vmem %s870_s3, %s558_s20 }
  0x10   : > { %284 = vmatpush.bf16.msra.mxu0 %v712_v3  ;;  %v718_v11 = vld [vmem:[%s868_s1 + $0xa0] sm:$0xff]  ;;  %v717_v14 = vld [vmem:[%s868_s1 + $0x98] sm:$0xff]  ;;  %v716_v17 = vld [vmem:[%s868_s1 + $0x90] sm:$0xff] }
  0x11   : > { %346 = vmatpush.bf16.msra.mxu1 %v704_v4  ;;  %v182_v18 = vld [vmem:[%s172_s22] sm:$0xff]  ;;  %v183_v19 = vld [vmem:[%s172_s22 + $0x8] sm:$0xff]  ;;  %vm639_vm2 = vmneg %vm186_vm0 }
  0x12   : > { %426 = vmatpush.bf16.msra.mxu2 %v720_v5  ;;  %v707_v20 = vld [vmem:[%s868_s1 + $0x48] sm:$0xff]  ;;  %v188_v22 = vrot.slane %v183_v19, 7  ;;  %v187_v23 = vrot.slane %v182_v18, 7  ;;  %v194_v25 = vrot.slane %v182_v18, 1  ;;  %v195_v26 = vrot.slane %v183_v19, 1  ;;  %v706_v27 = vld [vmem:[%s868_s1 + $0x40] sm:$0xff]  ;;  %vm640_vm4 = vmpackc.low %vm744_vm3, %vm639_vm2 }
  0x13   : > { %v699_v21 = vld [vmem:[%s868_s1 + $0x8] sm:$0xff]  ;;  %v698_v28 = vld [vmem:[%s868_s1] sm:$0xff]  ;;  %v217_v32 = vpack.c.bf16 %v183_v19, %v182_v18  ;;  %vm691_vm5 = vmpackc.low %vm193_vm1, %vm744_vm3 }
  0x14   : > { %285 = vmatpush.bf16.msra.mxu0 %v711_v6  ;;  %v715_v24 = vld [vmem:[%s868_s1 + $0x88] sm:$0xff]  ;;  %v189_v29 = vsel %vm186_vm0, %v187_v23, %v188_v22  ;;  %v714_v30 = vld [vmem:[%s868_s1 + $0x80] sm:$0xff]  ;;  %v196_v31 = vsel %vm193_vm1, %v194_v25, %v195_v26 }
  0x15   : > { %347 = vmatpush.bf16.msra.mxu1 %v703_v7  ;;  %v641_v33 = vpack.c.bf16 %v189_v29, %v187_v23  ;;  %v692_v34 = vpack.c.bf16 %v195_v26, %v196_v31 }
  0x16   : > { %427 = vmatpush.bf16.msra.mxu2 %v719_v8 }
  0x18   : > { %286 = vmatpush.bf16.msra.mxu0 %v710_v9 }
  0x19   : > { %348 = vmatpush.bf16.msra.mxu1 %v702_v10 }
  0x1a   : > { %428 = vmatpush.bf16.msra.mxu2 %v718_v11 }
  0x1c   : > { %287 = vmatpush.bf16.msra.mxu0 %v709_v12 }
  0x1d   : > { %349 = vmatpush.bf16.msra.mxu1 %v701_v13 }
  0x1e   : > { %429 = vmatpush.bf16.msra.mxu2 %v717_v14 }
  0x20   : > { %288 = vmatpush.bf16.msra.mxu0 %v708_v15 }
  0x21   : > { %350 = vmatpush.bf16.msra.mxu1 %v700_v16 }
  0x22   : > { %430 = vmatpush.bf16.msra.mxu2 %v716_v17 }
  0x24   : > { %289 = vmatpush.bf16.msra.mxu0 %v707_v20 }
  0x25   : > { %351 = vmatpush.bf16.msra.mxu1 %v699_v21 }
  0x26   : > { %431 = vmatpush.bf16.msra.mxu2 %v715_v24 }
  0x28   : > { %290 = vmatpush.bf16.msra.mxu0 %v706_v27 }
  0x29   : > { %352 = vmatpush.bf16.msra.mxu1 %v698_v28 }
  0x2a   : > { %432 = vmatpush.bf16.msra.mxu2 %v714_v30 }
  0x2b   : > { %291 = vmatmul.bf16.vlgmr.msra.gmra.mxu0 %v217_v32 }
  0x2c   : > { %642 = vmatmul.msk.bf16.vlgmr.msra.gmra.mxu1 %vm640_vm4, %v641_v33 }
  0x2d   : > { %693 = vmatmul.msk.bf16.vlgmr.msra.gmra.mxu2 %vm691_vm5, %v692_v34 }
  0xa8   : > { %v292_v35 = vpop.f32.mrf.mxu0 }
  0xa9   : > { %v354_v36 = vpop.f32.mrf.mxu1 }
  0xaa   : > { %v355_v38 = vadd.f32 %v354_v36, %v292_v35 }
  0xb0   : > { %v434_v37 = vpop.f32.mrf.mxu2  ;;  %v294_v39 = vpop.f32.mrf.mxu0 }
  0xb1   : > { %v356_v40 = vpop.f32.mrf.mxu1  ;;  %v439_v41 = vadd.f32 %v434_v37, %v355_v38 }
  0xb2   : > { %v357_v42 = vadd.f32 %v356_v40, %v294_v39 }
  0xb3   : > { %v452_v45 = vmul.f32 %v439_v41, %v439_v41 }
  0xb8   : > { %v436_v43 = vpop.f32.mrf.mxu2 }
  0xb9   : > { %v440_v44 = vadd.f32 %v436_v43, %v357_v42 }
  0xbb   : > { %v725_v46 = vpack.c.bf16 %v440_v44, %v439_v41  ;;  %v445_v47 = vadd.f32 %v440_v44, %v439_v41  ;;  %v453_v48 = vmul.f32 %v440_v44, %v440_v44 }
  0xbd   : > { %726 = vst [vmem:[%s177_s19] sm:$0xff] %v725_v46   ;;  %v446_v49 = vrot.slane %v445_v47, 4  ;;  %v454_v50 = vadd.f32 %v453_v48, %v452_v45 }
  0xbf   : > { %v447_v51 = vadd.f32 %v446_v49, %v445_v47  ;;  %v455_v52 = vrot.slane %v454_v50, 4 }
  0xc1   : > { %v448_v53 = vrot.slane %v447_v51, 2  ;;  %v456_v54 = vadd.f32 %v455_v52, %v454_v50 }
  0xc3   : > { %v449_v55 = vadd.f32 %v448_v53, %v447_v51  ;;  %v457_v56 = vrot.slane %v456_v54, 2 }
  0xc5   : > { %v450_v57 = vrot.slane %v449_v55, 1  ;;  %v458_v58 = vadd.f32 %v457_v56, %v456_v54 }
  0xc7   : > { %v459_v59 = vrot.slane %v458_v58, 1  ;;  %v451_v60 = vadd.f32 %v450_v57, %v449_v55 }
  0xc9   : > { %v460_v61 = vadd.f32 %v459_v59, %v458_v58 }
  0xcb   : > { %v461_v62 = vsel %vm186_vm0, %v451_v60, %v460_v61 }
  0xcc   : > { %462 = vst [vmem:[%s181_s23] sm:$0x3] %v461_v62 }
  0xcd PF: > { %s14_s12 = sadd.s32 1, %s742_s12  }
  0xce   : > { %p11_p4 = scmp.ge.s32.totalorder %s14_s12, 4  }
  0xd0   :  { %13 = sbr.rel (!%p11_p4) target bundleno = 1 (0x1), region = 72 }

// kernel: residual_block_forward.5
= control target key start
LH: loop header
LB: loop body
LE: loop exit
PB: predicated region body
PF: predicated region fallthrough
CT: control target
= control target key end

     0   :  { %s372_s15 = smov 0   ;;  %s398_s0 = inlined_call_operand.vmem [shape: bf16[2,16,128], index: 0, kind: input, shape index: {}]   ;;  %s399_s1 = inlined_call_operand.vmem [shape: f32[2,16,128], index: 1, kind: input, shape index: {}]   ;;  %s400_s2 = inlined_call_operand.vmem [shape: f32[1,128], index: 2, kind: input, shape index: {}]   ;;  %s401_s3 = inlined_call_operand.vmem [shape: f32[1,128], index: 3, kind: input, shape index: {}]   ;;  %s402_s4 = inlined_call_operand.vmem [shape: f32[2,16,128], index: 4, kind: output, shape index: {}]  }
   0x1 LB: > { %s309_s16 = sadd.s32 4294967295, %s345_s15   ;;  %p313_p0 = scmp.ge.s32.totalorder %s345_s15, 1  ;;  %s345_s15 = sphi %s372_s15, %s14_s15  }
   0x2   : > { %p172_p1 = scmp.lt.s32.totalorder %s345_s15, 3 }
   0x4   : > { %p173_p2 = pnand %p313_p0, %p172_p1 }
   0x5   : > { %p203_p3 = scmp.lt.s32.totalorder (!%p173_p2), %s309_s16, 1 }
   0x6   : > { %176 = sbr.rel (%p173_p2) target bundleno = 27 (0x1b), region = 36 }
   0xb   : > { %s404_s16 = smov (!%p203_p3, %s309_s16), 1  ;;  %v337_v0 = vld [vmem:[%s400_s2] ss:$0 sm:$0xff] }
   0xc   : > { %s322_s17 = sshll.u32 %s404_s16, 3  ;;  %s323_s18 = sshll.u32 %s404_s16, 4  ;;  %v338_v4 = vld [vmem:[%s401_s3] ss:$0 sm:$0xff] }
   0xd   : > { %s207_s21 = scalar_lea.vmem %s398_s0, %s322_s17  ;;  %s212_s26 = scalar_lea.vmem %s399_s1, %s323_s18 }
   0xe   : > { %v326_v1 = vld [vmem:[%s207_s21] sm:$0xff]   ;;  %v235_v8 = vld [vmem:[%s212_s26 + $0x8] sm:$0xff]  ;;  %s217_s5 = scalar_lea.vmem %s402_s4, %s323_s18 }
   0xf   : > { %v327_v2 = vunpack.c.l.bf16 %v326_v1  ;;  %v328_v3 = vunpack.c.h.bf16 %v326_v1  ;;  %v234_v7 = vld [vmem:[%s212_s26] sm:$0xff] }
  0x11   : > { %v226_v5 = vmul.f32 %v337_v0, %v327_v2  ;;  %v227_v6 = vmul.f32 %v337_v0, %v328_v3 }
  0x13   : > { %v232_v9 = vadd.f32 %v338_v4, %v226_v5  ;;  %v233_v10 = vadd.f32 %v338_v4, %v227_v6 }
  0x15   : > { %v236_v11 = vadd.f32 %v234_v7, %v232_v9  ;;  %v237_v12 = vadd.f32 %v235_v8, %v233_v10 }
  0x17   : > { %v238_v13 = vmax.f32 %v236_v11, 0.0  ;;  %v239_v14 = vmax.f32 %v237_v12, 0.0 }
  0x19   : > { %240 = vst [vmem:[%s217_s5] sm:$0xff] %v238_v13 }
  0x1a   : > { %241 = vst [vmem:[%s217_s5 + $0x8] sm:$0xff] %v239_v14 }
  0x1b PF: > { %s14_s15 = sadd.s32 1, %s345_s15  }
  0x1c   : > { %p11_p4 = scmp.ge.s32.totalorder %s14_s15, 4  }
  0x1e   :  { %13 = sbr.rel (!%p11_p4) target bundleno = 1 (0x1), region = 69 }

// kernel: residual_block_forward.4
= control target key start
LH: loop header
LB: loop body
LE: loop exit
PB: predicated region body
PF: predicated region fallthrough
CT: control target
= control target key end

     0   :  { %s851_s18 = smov 0   ;;  %s962_s0 = inlined_call_operand.vmem [shape: bf16[2,16,128], index: 0, kind: input, shape index: {}]   ;;  %s963_s1 = inlined_call_operand.vmem [shape: f32[1,128], index: 1, kind: input, shape index: {}]   ;;  %s964_s2 = inlined_call_operand.vmem [shape: f32[1,128], index: 2, kind: input, shape index: {}]   ;;  %s965_s3 = inlined_call_operand.vmem [shape: bf16[3,128,128], index: 3, kind: input, shape index: {}]   ;;  %s966_s4 = inlined_call_operand.vmem [shape: bf16[2,16,128], index: 4, kind: output, shape index: {0}]   ;;  %s967_s5 = inlined_call_operand.vmem [shape: f32[2,2,128], index: 5, kind: output, shape index: {1}]  }
   0x1 LB: > { %s619_s19 = sadd.s32 4294967295, %s818_s18   ;;  %p623_p0 = scmp.ge.s32.totalorder %s818_s18, 1  ;;  %s818_s18 = sphi %s851_s18, %s16_s18  }
   0x2   : > { %p190_p1 = scmp.lt.s32.totalorder %s818_s18, 3 }
   0x4   : > { %p191_p2 = pnand %p623_p0, %p190_p1 }
   0x5   : > { %p222_p3 = scmp.lt.s32.totalorder (!%p191_p2), %s619_s19, 1 }
   0x6   : > { %194 = sbr.rel (%p191_p2) target bundleno = 205 (0xcd), region = 36 }
   0xb   : > { %v783_v0 = vld [vmem:[%s965_s3 + $0x78] sm:$0xff]  ;;  %v782_v3 = vld [vmem:[%s965_s3 + $0x70] sm:$0xff]  ;;  %s969_s19 = smov (!%p222_p3, %s619_s19), 1  ;;  %v781_v6 = vld [vmem:[%s965_s3 + $0x68] sm:$0xff]  ;;  %vm256_vm0 = vcmask 1040384   ;;  %vm263_vm1 = vcmask 1046528  }
   0xc   : > { %v775_v1 = vld [vmem:[%s965_s3 + $0x38] sm:$0xff]  ;;  %353 = vmatpush.bf16.msra.mxu0 %v783_v0  ;;  %v774_v4 = vld [vmem:[%s965_s3 + $0x30] sm:$0xff]  ;;  %s766_s7 = sshll.u32 %s969_s19, 3  ;;  %v773_v7 = vld [vmem:[%s965_s3 + $0x28] sm:$0xff]  ;;  %vm820_vm3 = vmmov 1  }
   0xd   : > { %v791_v2 = vld [vmem:[%s965_s3 + $0xb8] sm:$0xff]  ;;  %415 = vmatpush.bf16.msra.mxu1 %v775_v1  ;;  %v790_v5 = vld [vmem:[%s965_s3 + $0xb0] sm:$0xff]  ;;  %s226_s10 = scalar_lea.vmem %s962_s0, %s766_s7  ;;  %v789_v8 = vld [vmem:[%s965_s3 + $0xa8] sm:$0xff]  ;;  %s231_s9 = scalar_lea.vmem %s966_s4, %s766_s7 }
   0xe   : > { %495 = vmatpush.bf16.msra.mxu2 %v791_v2  ;;  %v793_v9 = vld [vmem:[%s226_s10] sm:$0xff]   ;;  %v779_v19 = vld [vmem:[%s965_s3 + $0x58] sm:$0xff]  ;;  %v778_v24 = vld [vmem:[%s965_s3 + $0x50] sm:$0xff]  ;;  %s628_s10 = sshll.u32 %s969_s19, 1 }
   0xf   : > { %v810_v10 = vld [vmem:[%s963_s1] ss:$0 sm:$0xff]  ;;  %v794_v11 = vunpack.c.l.bf16 %v793_v9  ;;  %v795_v12 = vunpack.c.h.bf16 %v793_v9  ;;  %v771_v20 = vld [vmem:[%s965_s3 + $0x18] sm:$0xff]  ;;  %v770_v25 = vld [vmem:[%s965_s3 + $0x10] sm:$0xff]  ;;  %s235_s12 = scalar_lea.vmem %s967_s5, %s628_s10 }
  0x10   : > { %354 = vmatpush.bf16.msra.mxu0 %v782_v3  ;;  %v780_v13 = vld [vmem:[%s965_s3 + $0x60] sm:$0xff]  ;;  %v787_v23 = vld [vmem:[%s965_s3 + $0x98] sm:$0xff]  ;;  %v786_v28 = vld [vmem:[%s965_s3 + $0x90] sm:$0xff] }
  0x11   : > { %416 = vmatpush.bf16.msra.mxu1 %v774_v4  ;;  %v772_v14 = vld [vmem:[%s965_s3 + $0x20] sm:$0xff]  ;;  %v244_v17 = vmul.f32 %v810_v10, %v794_v11  ;;  %v245_v18 = vmul.f32 %v810_v10, %v795_v12  ;;  %v777_v29 = vld [vmem:[%s965_s3 + $0x48] sm:$0xff]  ;;  %vm709_vm2 = vmneg %vm256_vm0 }
  0x12   : > { %496 = vmatpush.bf16.msra.mxu2 %v790_v5  ;;  %v811_v15 = vld [vmem:[%s964_s2] ss:$0 sm:$0xff]  ;;  %v769_v30 = vld [vmem:[%s965_s3 + $0x8] sm:$0xff]  ;;  %vm710_vm4 = vmpackc.low %vm820_vm3, %vm709_vm2 }
  0x13   : > { %v788_v16 = vld [vmem:[%s965_s3 + $0xa0] sm:$0xff]  ;;  %v250_v21 = vadd.f32 %v811_v15, %v244_v17  ;;  %v251_v22 = vadd.f32 %v811_v15, %v245_v18  ;;  %v785_v33 = vld [vmem:[%s965_s3 + $0x88] sm:$0xff]  ;;  %vm761_vm5 = vmpackc.low %vm263_vm1, %vm820_vm3 }
  0x14   : > { %355 = vmatpush.bf16.msra.mxu0 %v781_v6  ;;  %v776_v36 = vld [vmem:[%s965_s3 + $0x40] sm:$0xff] }
  0x15   : > { %417 = vmatpush.bf16.msra.mxu1 %v773_v7  ;;  %v252_v26 = vmax.f32 %v250_v21, 0.0  ;;  %v253_v27 = vmax.f32 %v251_v22, 0.0  ;;  %v768_v37 = vld [vmem:[%s965_s3] sm:$0xff] }
  0x16   : > { %497 = vmatpush.bf16.msra.mxu2 %v789_v8  ;;  %v784_v39 = vld [vmem:[%s965_s3 + $0x80] sm:$0xff] }
  0x17   : > { %v257_v31 = vrot.slane %v252_v26, 7  ;;  %v258_v32 = vrot.slane %v253_v27, 7  ;;  %v264_v34 = vrot.slane %v252_v26, 1  ;;  %v265_v35 = vrot.slane %v253_v27, 1 }
  0x18   : > { %356 = vmatpush.bf16.msra.mxu0 %v780_v13  ;;  %v287_v41 = vpack.c.bf16 %v253_v27, %v252_v26 }
  0x19   : > { %418 = vmatpush.bf16.msra.mxu1 %v772_v14  ;;  %v259_v38 = vsel %vm256_vm0, %v257_v31, %v258_v32  ;;  %v266_v40 = vsel %vm263_vm1, %v264_v34, %v265_v35 }
  0x1a   : > { %498 = vmatpush.bf16.msra.mxu2 %v788_v16  ;;  %v711_v42 = vpack.c.bf16 %v259_v38, %v257_v31  ;;  %v762_v43 = vpack.c.bf16 %v265_v35, %v266_v40 }
  0x1c   : > { %357 = vmatpush.bf16.msra.mxu0 %v779_v19 }
  0x1d   : > { %419 = vmatpush.bf16.msra.mxu1 %v771_v20 }
  0x1e   : > { %499 = vmatpush.bf16.msra.mxu2 %v787_v23 }
  0x20   : > { %358 = vmatpush.bf16.msra.mxu0 %v778_v24 }
  0x21   : > { %420 = vmatpush.bf16.msra.mxu1 %v770_v25 }
  0x22   : > { %500 = vmatpush.bf16.msra.mxu2 %v786_v28 }
  0x24   : > { %359 = vmatpush.bf16.msra.mxu0 %v777_v29 }
  0x25   : > { %421 = vmatpush.bf16.msra.mxu1 %v769_v30 }
  0x26   : > { %501 = vmatpush.bf16.msra.mxu2 %v785_v33 }
  0x28   : > { %360 = vmatpush.bf16.msra.mxu0 %v776_v36 }
  0x29   : > { %422 = vmatpush.bf16.msra.mxu1 %v768_v37 }
  0x2a   : > { %502 = vmatpush.bf16.msra.mxu2 %v784_v39 }
  0x2b   : > { %361 = vmatmul.bf16.vlgmr.msra.gmra.mxu0 %v287_v41 }
  0x2c   : > { %712 = vmatmul.msk.bf16.vlgmr.msra.gmra.mxu1 %vm710_vm4, %v711_v42 }
  0x2d   : > { %763 = vmatmul.msk.bf16.vlgmr.msra.gmra.mxu2 %vm761_vm5, %v762_v43 }
  0xa8   : > { %v362_v44 = vpop.f32.mrf.mxu0 }
  0xa9   : > { %v424_v45 = vpop.f32.mrf.mxu1 }
  0xaa   : > { %v425_v47 = vadd.f32 %v424_v45, %v362_v44 }
  0xb0   : > { %v504_v46 = vpop.f32.mrf.mxu2  ;;  %v364_v48 = vpop.f32.mrf.mxu0 }
  0xb1   : > { %v426_v49 = vpop.f32.mrf.mxu1  ;;  %v509_v50 = vadd.f32 %v504_v46, %v425_v47 }
  0xb2   : > { %v427_v51 = vadd.f32 %v426_v49, %v364_v48 }
  0xb3   : > { %v522_v54 = vmul.f32 %v509_v50, %v509_v50 }
  0xb8   : > { %v506_v52 = vpop.f32.mrf.mxu2 }
  0xb9   : > { %v510_v53 = vadd.f32 %v506_v52, %v427_v51 }
  0xbb   : > { %v799_v55 = vpack.c.bf16 %v510_v53, %v509_v50  ;;  %v515_v56 = vadd.f32 %v510_v53, %v509_v50  ;;  %v523_v57 = vmul.f32 %v510_v53, %v510_v53 }
  0xbd   : > { %800 = vst [vmem:[%s231_s9] sm:$0xff] %v799_v55   ;;  %v516_v58 = vrot.slane %v515_v56, 4  ;;  %v524_v59 = vadd.f32 %v523_v57, %v522_v54 }
  0xbf   : > { %v517_v60 = vadd.f32 %v516_v58, %v515_v56  ;;  %v525_v61 = vrot.slane %v524_v59, 4 }
  0xc1   : > { %v518_v62 = vrot.slane %v517_v60, 2  ;;  %v526_v63 = vadd.f32 %v525_v61, %v524_v59 }
  0xc3   : > { %v519_v0 = vadd.f32 %v518_v62, %v517_v60  ;;  %v527_v1 = vrot.slane %v526_v63, 2 }
  0xc5   : > { %v520_v2 = vrot.slane %v519_v0, 1  ;;  %v528_v3 = vadd.f32 %v527_v1, %v526_v63 }
  0xc7   : > { %v529_v4 = vrot.slane %v528_v3, 1  ;;  %v521_v5 = vadd.f32 %v520_v2, %v519_v0 }
  0xc9   : > { %v530_v6 = vadd.f32 %v529_v4, %v528_v3 }
  0xcb   : > { %v531_v7 = vsel %vm256_vm0, %v521_v5, %v530_v6 }
  0xcc   : > { %532 = vst [vmem:[%s235_s12] sm:$0x3] %v531_v7 }
  0xcd PF: > { %s16_s18 = sadd.s32 1, %s818_s18  }
  0xce   : > { %p13_p4 = scmp.ge.s32.totalorder %s16_s18, 4  }
  0xd0   :  { %15 = sbr.rel (!%p13_p4) target bundleno = 1 (0x1), region = 80 }

</bundles_post_ra>
